<compile_context>
chip_gen: v6e
topology: v6e:2x2x1
jax: 0.10.0
libtpu: 0.0.40
codegen_flags: <defaults>
</compile_context>

<pallas_src>
import jax
import jax.numpy as jnp
from jax.experimental import pallas as pl
from jax.experimental.pallas import tpu as pltpu


def _round_up(x, m):
    return (x + m - 1) // m * m


def _make_rgcn_kernel(L, R, Np, F):
    """Build the fully-unrolled fused RGCN kernel (single grid step)."""

    def kernel(a_ref, x_ref, w_ref, b_ref, o_ref, xw_ref):
        # a_ref : (Np, R*Np)  bf16  relation-concatenated normalized adjacency
        # x_ref : (Np, F)     bf16  padded input features
        # w_ref : (L*R, F, F) bf16  per-(layer, relation) weights, zero-padded to F
        # b_ref : (L, 1, F)   f32   per-layer bias, pre-summed over relations
        # o_ref : (Np, F)     f32   padded output
        # xw_ref: (R*Np, F)   bf16  scratch: stacked per-relation H @ W_{l,r}
        a = a_ref[...]                     # loaded once; reused by all layers
        h = x_ref[...]                     # bf16 hidden state, lives in vregs

        for l in range(L):                 # fully unrolled (static trip counts)
            for r in range(R):
                xw = jnp.dot(h, w_ref[l * R + r],
                             preferred_element_type=jnp.float32)
                xw_ref[r * Np:(r + 1) * Np, :] = xw.astype(jnp.bfloat16)

            # One MXU pass sums over (relation, source node): y = A_cat @ XW_stack.
            y = jnp.dot(a, xw_ref[...], preferred_element_type=jnp.float32)
            y = y + b_ref[l]               # f32 epilogue (v5e VPU has no bf16)

            if l < L - 1:
                h = jnp.maximum(y, 0.0).astype(jnp.bfloat16)
            else:
                o_ref[...] = y             # lane-dense (F=128) unmasked store

    return kernel


@jax.jit
def rgcn_forward(a_norm, x, params):
    """a_norm: [R, N, N] f32, x: [N, F_in] f32, params: w{1..3} [R, fi, fo], b{1..3} [R, fo]."""
    R, N, _ = a_norm.shape
    L = 3
    layer_keys = (("w1", "b1"), ("w2", "b2"), ("w3", "b3"))
    out_feats = params["w3"].shape[2]

    # Common lane-dense feature width (all toy dims <= 128; for realistic widths pad
    # per-layer instead of to max(dims) to avoid inflating the Np^2*F adjacency matmul).
    all_dims = [x.shape[1]] + [params[wk].shape[2] for wk, _ in layer_keys]
    F = _round_up(max(all_dims + [128]), 128)
    Np = _round_up(N, 16)                  # bf16 packs 16 sublanes per vreg

    # Stack + zero-pad weights to [L*R, F, F] and relation-summed biases to [L, 1, F].
    w_stack = jnp.zeros((L * R, F, F), jnp.float32)
    b_stack = jnp.zeros((L, 1, F), jnp.float32)
    for li, (wk, bk) in enumerate(layer_keys):
        w = params[wk]                                      # [R, fi, fo]
        b = params[bk]                                      # [R, fo]
        fi, fo = w.shape[1], w.shape[2]
        w_stack = w_stack.at[li * R:(li + 1) * R, :fi, :fo].set(w)
        b_stack = b_stack.at[li, 0, :fo].set(jnp.sum(b, axis=0))

    # Relation-concatenated adjacency: a_cat[d, r*Np + s] = a_norm[r, d, s]  (bf16 feed).
    a_pad = jnp.zeros((R, Np, Np), jnp.float32).at[:, :N, :N].set(a_norm)
    a_cat = jnp.transpose(a_pad, (1, 0, 2)).reshape(Np, R * Np).astype(jnp.bfloat16)
    w_bf = w_stack.astype(jnp.bfloat16)
    x_pad = jnp.zeros((Np, F), jnp.bfloat16).at[:N, :x.shape[1]].set(
        x.astype(jnp.bfloat16))

    flops = 2 * L * (R * Np * F * F + Np * (R * Np) * F)
    bytes_accessed = (a_cat.size * 2 + w_bf.size * 2 + x_pad.size * 2
                      + b_stack.size * 4 + Np * F * 4)

    out_pad = pl.pallas_call(
        _make_rgcn_kernel(L, R, Np, F),
        out_shape=jax.ShapeDtypeStruct((Np, F), jnp.float32),
        scratch_shapes=[pltpu.VMEM((R * Np, F), jnp.bfloat16)],   # stacked XW staging
        cost_estimate=pl.CostEstimate(flops=flops, transcendentals=0,
                                      bytes_accessed=bytes_accessed),
    )(a_cat, x_pad, w_bf, b_stack)

    return out_pad[:N, :out_feats]


def normalize_adjacency(adj):
    """DGL GraphConv norm='both': D_dst^{-1/2} A D_src^{-1/2}, degrees clamped to >=1."""
    deg_dst = jnp.clip(jnp.sum(adj, axis=2), 1.0, None)     # in-degrees,  [R, N_dst]
    deg_src = jnp.clip(jnp.sum(adj, axis=1), 1.0, None)     # out-degrees, [R, N_src]
    return adj * (deg_dst ** -0.5)[:, :, None] * (deg_src ** -0.5)[:, None, :]


def rgcn_reference(a_norm, x, params):
    """Pure-JAX reference using the same bf16 MXU feeds / f32 accumulation as the kernel."""
    a_bf = a_norm.astype(jnp.bfloat16)
    h = x
    for (wk, bk, relu) in (("w1", "b1", True), ("w2", "b2", True), ("w3", "b3", False)):
        w = params[wk].astype(jnp.bfloat16)
        b = params[bk]
        h_bf = h.astype(jnp.bfloat16)
        y = jnp.zeros((h.shape[0], w.shape[2]), jnp.float32)
        for r in range(w.shape[0]):
            xw = jnp.dot(h_bf, w[r], preferred_element_type=jnp.float32)
            y = y + jnp.dot(a_bf[r], xw.astype(jnp.bfloat16),
                            preferred_element_type=jnp.float32)
        y = y + jnp.sum(b, axis=0)[None, :]
        h = jnp.maximum(y, 0.0) if relu else y
    return h


def init_params(key, rel_names, in_feats, hid1, hid2, out_feats):
    """Deterministic synthetic init (xavier-uniform-ish weights, small random biases)."""
    R = len(rel_names)
    dims = [(in_feats, hid1), (hid1, hid2), (hid2, out_feats)]
    params = {}
    for i, (fi, fo) in enumerate(dims, start=1):
        key, kw, kb = jax.random.split(key, 3)
        lim = (6.0 / (fi + fo)) ** 0.5
        params[f"w{i}"] = jax.random.uniform(kw, (R, fi, fo), jnp.float32, -lim, lim)
        params[f"b{i}"] = 0.1 * jax.random.normal(kb, (R, fo), jnp.float32)
    return params


if __name__ == "__main__":
    # Small synthetic heterogeneous graph: one node type, 3 relation types.
    N = 16
    rel_names = ["follows", "likes", "knows"]
    R = len(rel_names)
    in_feats, hid_feats1, hid_feats2, out_feats = 8, 32, 16, 8

    key = jax.random.PRNGKey(0)
    key, k_adj, k_x, k_p = jax.random.split(key, 4)

    adj = jax.random.bernoulli(k_adj, 0.3, (R, N, N)).astype(jnp.float32)  # [R, N_dst, N_src]
    x = jax.random.normal(k_x, (N, in_feats), jnp.float32)                 # node features
    params = init_params(k_p, rel_names, in_feats, hid_feats1, hid_feats2, out_feats)

    a_norm = normalize_adjacency(adj)

    out = jax.block_until_ready(rgcn_forward(a_norm, x, params))
    ref = rgcn_reference(a_norm, x, params)

    assert out.shape == (N, out_feats)
    assert jnp.allclose(out, ref, atol=2e-2, rtol=2e-2), "mismatch vs pure-JAX reference"

    print("KERNEL_OK")
</pallas_src>

<mosaic_0001>
module attributes {stable_mosaic.version = 11 : i64} {
  func.func @kernel(%arg0: memref<16x48xbf16, #tpu.memory_space<vmem>>, %arg1: memref<16x128xbf16, #tpu.memory_space<vmem>>, %arg2: memref<9x128x128xbf16, #tpu.memory_space<vmem>>, %arg3: memref<3x1x128xf32, #tpu.memory_space<vmem>>, %arg4: memref<16x128xf32, #tpu.memory_space<vmem>>, %arg5: memref<48x128xbf16, #tpu.memory_space<vmem>>) attributes {dimension_semantics = [], scalar_prefetch = 0 : i64, scratch_operands = 1 : i64, tpu.core_type = #tpu.core_type<tc>} {
    %c0 = arith.constant 0 : index
    %c0_0 = arith.constant 0 : index
    %0 = vector.load %arg0[%c0, %c0_0] : memref<16x48xbf16, #tpu.memory_space<vmem>>, vector<16x48xbf16>
    %c0_1 = arith.constant 0 : index
    %c0_2 = arith.constant 0 : index
    %1 = vector.load %arg1[%c0_1, %c0_2] : memref<16x128xbf16, #tpu.memory_space<vmem>>, vector<16x128xbf16>
    %c0_3 = arith.constant 0 : index
    %c0_4 = arith.constant 0 : index
    %c0_5 = arith.constant 0 : index
    %2 = vector.load %arg2[%c0_3, %c0_4, %c0_5] : memref<9x128x128xbf16, #tpu.memory_space<vmem>>, vector<1x128x128xbf16>
    %3 = vector.shape_cast %2 : vector<1x128x128xbf16> to vector<128x128xbf16>
    %cst = arith.constant dense<0.000000e+00> : vector<16x128xf32>
    %4 = tpu.matmul %1, %3, %cst {dimension_numbers = #tpu.dot_dimension_numbers<[1], [0], [0], [1], [0, 0, 1, 1], [], []>} : vector<16x128xbf16>, vector<128x128xbf16>, vector<16x128xf32> -> vector<16x128xf32>
    %5 = arith.truncf %4 : vector<16x128xf32> to vector<16x128xbf16>
    %c0_6 = arith.constant 0 : index
    %c0_7 = arith.constant 0 : index
    %6 = vector.load %arg5[%c0_6, %c0_7] : memref<48x128xbf16, #tpu.memory_space<vmem>>, vector<16x128xbf16>
    tpu.vector_store %arg5[%c0_6, %c0_7], %5 {strides = array<i32>} : memref<48x128xbf16, #tpu.memory_space<vmem>>, vector<16x128xbf16>,
    %c1 = arith.constant 1 : index
    %c0_8 = arith.constant 0 : index
    %c0_9 = arith.constant 0 : index
    %7 = vector.load %arg2[%c1, %c0_8, %c0_9] : memref<9x128x128xbf16, #tpu.memory_space<vmem>>, vector<1x128x128xbf16>
    %8 = vector.shape_cast %7 : vector<1x128x128xbf16> to vector<128x128xbf16>
    %cst_10 = arith.constant dense<0.000000e+00> : vector<16x128xf32>
    %9 = tpu.matmul %1, %8, %cst_10 {dimension_numbers = #tpu.dot_dimension_numbers<[1], [0], [0], [1], [0, 0, 1, 1], [], []>} : vector<16x128xbf16>, vector<128x128xbf16>, vector<16x128xf32> -> vector<16x128xf32>
    %10 = arith.truncf %9 : vector<16x128xf32> to vector<16x128xbf16>
    %c16 = arith.constant 16 : index
    %c0_11 = arith.constant 0 : index
    %11 = vector.load %arg5[%c16, %c0_11] : memref<48x128xbf16, #tpu.memory_space<vmem>>, vector<16x128xbf16>
    tpu.vector_store %arg5[%c16, %c0_11], %10 {strides = array<i32>} : memref<48x128xbf16, #tpu.memory_space<vmem>>, vector<16x128xbf16>,
    %c2 = arith.constant 2 : index
    %c0_12 = arith.constant 0 : index
    %c0_13 = arith.constant 0 : index
    %12 = vector.load %arg2[%c2, %c0_12, %c0_13] : memref<9x128x128xbf16, #tpu.memory_space<vmem>>, vector<1x128x128xbf16>
    %13 = vector.shape_cast %12 : vector<1x128x128xbf16> to vector<128x128xbf16>
    %cst_14 = arith.constant dense<0.000000e+00> : vector<16x128xf32>
    %14 = tpu.matmul %1, %13, %cst_14 {dimension_numbers = #tpu.dot_dimension_numbers<[1], [0], [0], [1], [0, 0, 1, 1], [], []>} : vector<16x128xbf16>, vector<128x128xbf16>, vector<16x128xf32> -> vector<16x128xf32>
    %15 = arith.truncf %14 : vector<16x128xf32> to vector<16x128xbf16>
    %c32 = arith.constant 32 : index
    %c0_15 = arith.constant 0 : index
    %16 = vector.load %arg5[%c32, %c0_15] : memref<48x128xbf16, #tpu.memory_space<vmem>>, vector<16x128xbf16>
    tpu.vector_store %arg5[%c32, %c0_15], %15 {strides = array<i32>} : memref<48x128xbf16, #tpu.memory_space<vmem>>, vector<16x128xbf16>,
    %c0_16 = arith.constant 0 : index
    %c0_17 = arith.constant 0 : index
    %17 = vector.load %arg5[%c0_16, %c0_17] : memref<48x128xbf16, #tpu.memory_space<vmem>>, vector<48x128xbf16>
    %cst_18 = arith.constant dense<0.000000e+00> : vector<16x128xf32>
    %18 = tpu.matmul %0, %17, %cst_18 {dimension_numbers = #tpu.dot_dimension_numbers<[1], [0], [0], [1], [0, 0, 1, 1], [], []>} : vector<16x48xbf16>, vector<48x128xbf16>, vector<16x128xf32> -> vector<16x128xf32>
    %c0_19 = arith.constant 0 : index
    %c0_20 = arith.constant 0 : index
    %c0_21 = arith.constant 0 : index
    %19 = vector.load %arg3[%c0_19, %c0_20, %c0_21] : memref<3x1x128xf32, #tpu.memory_space<vmem>>, vector<1x1x128xf32>
    %20 = vector.shape_cast %19 : vector<1x1x128xf32> to vector<1x128xf32>
    %21 = vector.broadcast %20 : vector<1x128xf32> to vector<16x128xf32>
    %22 = arith.addf %18, %21 : vector<16x128xf32>
    %cst_22 = arith.constant 0.000000e+00 : f32
    %23 = vector.broadcast %cst_22 : f32 to vector<16x128xf32>
    %24 = arith.maximumf %22, %23 : vector<16x128xf32>
    %25 = arith.truncf %24 : vector<16x128xf32> to vector<16x128xbf16>
    %c3 = arith.constant 3 : index
    %c0_23 = arith.constant 0 : index
    %c0_24 = arith.constant 0 : index
    %26 = vector.load %arg2[%c3, %c0_23, %c0_24] : memref<9x128x128xbf16, #tpu.memory_space<vmem>>, vector<1x128x128xbf16>
    %27 = vector.shape_cast %26 : vector<1x128x128xbf16> to vector<128x128xbf16>
    %cst_25 = arith.constant dense<0.000000e+00> : vector<16x128xf32>
    %28 = tpu.matmul %25, %27, %cst_25 {dimension_numbers = #tpu.dot_dimension_numbers<[1], [0], [0], [1], [0, 0, 1, 1], [], []>} : vector<16x128xbf16>, vector<128x128xbf16>, vector<16x128xf32> -> vector<16x128xf32>
    %29 = arith.truncf %28 : vector<16x128xf32> to vector<16x128xbf16>
    %c0_26 = arith.constant 0 : index
    %c0_27 = arith.constant 0 : index
    %30 = vector.load %arg5[%c0_26, %c0_27] : memref<48x128xbf16, #tpu.memory_space<vmem>>, vector<16x128xbf16>
    tpu.vector_store %arg5[%c0_26, %c0_27], %29 {strides = array<i32>} : memref<48x128xbf16, #tpu.memory_space<vmem>>, vector<16x128xbf16>,
    %c4 = arith.constant 4 : index
    %c0_28 = arith.constant 0 : index
    %c0_29 = arith.constant 0 : index
    %31 = vector.load %arg2[%c4, %c0_28, %c0_29] : memref<9x128x128xbf16, #tpu.memory_space<vmem>>, vector<1x128x128xbf16>
    %32 = vector.shape_cast %31 : vector<1x128x128xbf16> to vector<128x128xbf16>
    %cst_30 = arith.constant dense<0.000000e+00> : vector<16x128xf32>
    %33 = tpu.matmul %25, %32, %cst_30 {dimension_numbers = #tpu.dot_dimension_numbers<[1], [0], [0], [1], [0, 0, 1, 1], [], []>} : vector<16x128xbf16>, vector<128x128xbf16>, vector<16x128xf32> -> vector<16x128xf32>
    %34 = arith.truncf %33 : vector<16x128xf32> to vector<16x128xbf16>
    %c16_31 = arith.constant 16 : index
    %c0_32 = arith.constant 0 : index
    %35 = vector.load %arg5[%c16_31, %c0_32] : memref<48x128xbf16, #tpu.memory_space<vmem>>, vector<16x128xbf16>
    tpu.vector_store %arg5[%c16_31, %c0_32], %34 {strides = array<i32>} : memref<48x128xbf16, #tpu.memory_space<vmem>>, vector<16x128xbf16>,
    %c5 = arith.constant 5 : index
    %c0_33 = arith.constant 0 : index
    %c0_34 = arith.constant 0 : index
    %36 = vector.load %arg2[%c5, %c0_33, %c0_34] : memref<9x128x128xbf16, #tpu.memory_space<vmem>>, vector<1x128x128xbf16>
    %37 = vector.shape_cast %36 : vector<1x128x128xbf16> to vector<128x128xbf16>
    %cst_35 = arith.constant dense<0.000000e+00> : vector<16x128xf32>
    %38 = tpu.matmul %25, %37, %cst_35 {dimension_numbers = #tpu.dot_dimension_numbers<[1], [0], [0], [1], [0, 0, 1, 1], [], []>} : vector<16x128xbf16>, vector<128x128xbf16>, vector<16x128xf32> -> vector<16x128xf32>
    %39 = arith.truncf %38 : vector<16x128xf32> to vector<16x128xbf16>
    %c32_36 = arith.constant 32 : index
    %c0_37 = arith.constant 0 : index
    %40 = vector.load %arg5[%c32_36, %c0_37] : memref<48x128xbf16, #tpu.memory_space<vmem>>, vector<16x128xbf16>
    tpu.vector_store %arg5[%c32_36, %c0_37], %39 {strides = array<i32>} : memref<48x128xbf16, #tpu.memory_space<vmem>>, vector<16x128xbf16>,
    %c0_38 = arith.constant 0 : index
    %c0_39 = arith.constant 0 : index
    %41 = vector.load %arg5[%c0_38, %c0_39] : memref<48x128xbf16, #tpu.memory_space<vmem>>, vector<48x128xbf16>
    %cst_40 = arith.constant dense<0.000000e+00> : vector<16x128xf32>
    %42 = tpu.matmul %0, %41, %cst_40 {dimension_numbers = #tpu.dot_dimension_numbers<[1], [0], [0], [1], [0, 0, 1, 1], [], []>} : vector<16x48xbf16>, vector<48x128xbf16>, vector<16x128xf32> -> vector<16x128xf32>
    %c1_41 = arith.constant 1 : index
    %c0_42 = arith.constant 0 : index
    %c0_43 = arith.constant 0 : index
    %43 = vector.load %arg3[%c1_41, %c0_42, %c0_43] : memref<3x1x128xf32, #tpu.memory_space<vmem>>, vector<1x1x128xf32>
    %44 = vector.shape_cast %43 : vector<1x1x128xf32> to vector<1x128xf32>
    %45 = vector.broadcast %44 : vector<1x128xf32> to vector<16x128xf32>
    %46 = arith.addf %42, %45 : vector<16x128xf32>
    %cst_44 = arith.constant 0.000000e+00 : f32
    %47 = vector.broadcast %cst_44 : f32 to vector<16x128xf32>
    %48 = arith.maximumf %46, %47 : vector<16x128xf32>
    %49 = arith.truncf %48 : vector<16x128xf32> to vector<16x128xbf16>
    %c6 = arith.constant 6 : index
    %c0_45 = arith.constant 0 : index
    %c0_46 = arith.constant 0 : index
    %50 = vector.load %arg2[%c6, %c0_45, %c0_46] : memref<9x128x128xbf16, #tpu.memory_space<vmem>>, vector<1x128x128xbf16>
    %51 = vector.shape_cast %50 : vector<1x128x128xbf16> to vector<128x128xbf16>
    %cst_47 = arith.constant dense<0.000000e+00> : vector<16x128xf32>
    %52 = tpu.matmul %49, %51, %cst_47 {dimension_numbers = #tpu.dot_dimension_numbers<[1], [0], [0], [1], [0, 0, 1, 1], [], []>} : vector<16x128xbf16>, vector<128x128xbf16>, vector<16x128xf32> -> vector<16x128xf32>
    %53 = arith.truncf %52 : vector<16x128xf32> to vector<16x128xbf16>
    %c0_48 = arith.constant 0 : index
    %c0_49 = arith.constant 0 : index
    %54 = vector.load %arg5[%c0_48, %c0_49] : memref<48x128xbf16, #tpu.memory_space<vmem>>, vector<16x128xbf16>
    tpu.vector_store %arg5[%c0_48, %c0_49], %53 {strides = array<i32>} : memref<48x128xbf16, #tpu.memory_space<vmem>>, vector<16x128xbf16>,
    %c7 = arith.constant 7 : index
    %c0_50 = arith.constant 0 : index
    %c0_51 = arith.constant 0 : index
    %55 = vector.load %arg2[%c7, %c0_50, %c0_51] : memref<9x128x128xbf16, #tpu.memory_space<vmem>>, vector<1x128x128xbf16>
    %56 = vector.shape_cast %55 : vector<1x128x128xbf16> to vector<128x128xbf16>
    %cst_52 = arith.constant dense<0.000000e+00> : vector<16x128xf32>
    %57 = tpu.matmul %49, %56, %cst_52 {dimension_numbers = #tpu.dot_dimension_numbers<[1], [0], [0], [1], [0, 0, 1, 1], [], []>} : vector<16x128xbf16>, vector<128x128xbf16>, vector<16x128xf32> -> vector<16x128xf32>
    %58 = arith.truncf %57 : vector<16x128xf32> to vector<16x128xbf16>
    %c16_53 = arith.constant 16 : index
    %c0_54 = arith.constant 0 : index
    %59 = vector.load %arg5[%c16_53, %c0_54] : memref<48x128xbf16, #tpu.memory_space<vmem>>, vector<16x128xbf16>
    tpu.vector_store %arg5[%c16_53, %c0_54], %58 {strides = array<i32>} : memref<48x128xbf16, #tpu.memory_space<vmem>>, vector<16x128xbf16>,
    %c8 = arith.constant 8 : index
    %c0_55 = arith.constant 0 : index
    %c0_56 = arith.constant 0 : index
    %60 = vector.load %arg2[%c8, %c0_55, %c0_56] : memref<9x128x128xbf16, #tpu.memory_space<vmem>>, vector<1x128x128xbf16>
    %61 = vector.shape_cast %60 : vector<1x128x128xbf16> to vector<128x128xbf16>
    %cst_57 = arith.constant dense<0.000000e+00> : vector<16x128xf32>
    %62 = tpu.matmul %49, %61, %cst_57 {dimension_numbers = #tpu.dot_dimension_numbers<[1], [0], [0], [1], [0, 0, 1, 1], [], []>} : vector<16x128xbf16>, vector<128x128xbf16>, vector<16x128xf32> -> vector<16x128xf32>
    %63 = arith.truncf %62 : vector<16x128xf32> to vector<16x128xbf16>
    %c32_58 = arith.constant 32 : index
    %c0_59 = arith.constant 0 : index
    %64 = vector.load %arg5[%c32_58, %c0_59] : memref<48x128xbf16, #tpu.memory_space<vmem>>, vector<16x128xbf16>
    tpu.vector_store %arg5[%c32_58, %c0_59], %63 {strides = array<i32>} : memref<48x128xbf16, #tpu.memory_space<vmem>>, vector<16x128xbf16>,
    %c0_60 = arith.constant 0 : index
    %c0_61 = arith.constant 0 : index
    %65 = vector.load %arg5[%c0_60, %c0_61] : memref<48x128xbf16, #tpu.memory_space<vmem>>, vector<48x128xbf16>
    %cst_62 = arith.constant dense<0.000000e+00> : vector<16x128xf32>
    %66 = tpu.matmul %0, %65, %cst_62 {dimension_numbers = #tpu.dot_dimension_numbers<[1], [0], [0], [1], [0, 0, 1, 1], [], []>} : vector<16x48xbf16>, vector<48x128xbf16>, vector<16x128xf32> -> vector<16x128xf32>
    %c2_63 = arith.constant 2 : index
    %c0_64 = arith.constant 0 : index
    %c0_65 = arith.constant 0 : index
    %67 = vector.load %arg3[%c2_63, %c0_64, %c0_65] : memref<3x1x128xf32, #tpu.memory_space<vmem>>, vector<1x1x128xf32>
    %68 = vector.shape_cast %67 : vector<1x1x128xf32> to vector<1x128xf32>
    %69 = vector.broadcast %68 : vector<1x128xf32> to vector<16x128xf32>
    %70 = arith.addf %66, %69 : vector<16x128xf32>
    %c0_66 = arith.constant 0 : index
    %c0_67 = arith.constant 0 : index
    %71 = vector.load %arg4[%c0_66, %c0_67] : memref<16x128xf32, #tpu.memory_space<vmem>>, vector<16x128xf32>
    tpu.vector_store %arg4[%c0_66, %c0_67], %70 {strides = array<i32>} : memref<16x128xf32, #tpu.memory_space<vmem>>, vector<16x128xf32>,
    return
  }
}

</mosaic_0001>

<bundles_post_ra>
// kernel: rgcn_forward.1
= control target key start
LH: loop header
LB: loop body
LE: loop exit
PB: predicated region body
PF: predicated region fallthrough
CT: control target
= control target key end

     0   :  { %v2004_v0 = vmov 0.0   ;;  %vm2005_vm0 = vmmov 0   ;;  %vm411_vm1 = vcmask 392192   ;;  %s2381_s2 = inlined_call_operand.vmem [shape: bf16[9,128,128], index: 2, kind: input, shape index: {}]   ;;  %s2382_s1 = inlined_call_operand.vmem [shape: bf16[16,128], index: 1, kind: input, shape index: {}]   ;;  %s2383_s0 = inlined_call_operand.vmem [shape: bf16[16,48], index: 0, kind: input, shape index: {}]   ;;  %s2384_s3 = inlined_call_operand.vmem [shape: f32[3,1,128], index: 3, kind: input, shape index: {}]   ;;  %s2385_s4 = inlined_call_operand.vmem [shape: f32[16,128], index: 4, kind: output, shape index: {}]  }
   0x1   :  { %1709 = vmatprep.subr.bf16.mxu0 %v2004_v0  ;;  %v1921_v1 = vld [vmem:[%s2381_s2 + $0x38] sm:$0xff]   ;;  %1729 = vmatprep.subr.bf16.mxu1 %v2004_v0  ;;  %v1922_v2 = vld [vmem:[%s2381_s2 + $0x30] sm:$0xff]   ;;  %v1923_v3 = vld [vmem:[%s2381_s2 + $0x28] sm:$0xff]  }
   0x2   :  { %1725 = vmatprep.mubr.msk.bf16.mxu0 %vm2005_vm0, %v2004_v0  ;;  %1745 = vmatprep.mubr.msk.bf16.mxu1 %vm2005_vm0, %v2004_v0  ;;  %v1929_v4 = vld [vmem:[%s2381_s2 + $0x78] sm:$0xff]   ;;  %v1924_v5 = vld [vmem:[%s2381_s2 + $0x20] sm:$0xff]   ;;  %v1932_v6 = vld [vmem:[%s2381_s2 + $0x70] sm:$0xff]  }
   0x3   :  { %1710 = vmatpush3.bf16.msra.mxu0 %v1921_v1  ;;  %1730 = vmatpush3.bf16.msra.mxu1 %v1929_v4  ;;  %v1925_v7 = vld [vmem:[%s2381_s2 + $0x18] sm:$0xff]   ;;  %v1934_v8 = vld [vmem:[%s2381_s2 + $0x68] sm:$0xff]   ;;  %v1926_v9 = vld [vmem:[%s2381_s2 + $0x10] sm:$0xff]  }
   0x4   :  { %1711 = vmatprep.subr.bf16.mxu0 %v2004_v0  ;;  %1731 = vmatprep.subr.bf16.mxu1 %v2004_v0  ;;  %v1936_v10 = vld [vmem:[%s2381_s2 + $0x60] sm:$0xff]   ;;  %v1927_v11 = vld [vmem:[%s2381_s2 + $0x8] sm:$0xff]   ;;  %v1938_v12 = vld [vmem:[%s2381_s2 + $0x58] sm:$0xff]  }
   0x5   :  { %v1928_v13 = vld [vmem:[%s2381_s2] sm:$0xff]   ;;  %v1940_v14 = vld [vmem:[%s2381_s2 + $0x50] sm:$0xff]   ;;  %v1931_v16 = vld [vmem:[%s2381_s2 + $0xb8] sm:$0xff]  }
   0x6   :  { %v1930_v15 = vld [vmem:[%s2382_s1] sm:$0xff]   ;;  %v1942_v17 = vld [vmem:[%s2381_s2 + $0x48] sm:$0xff]   ;;  %v1933_v18 = vld [vmem:[%s2381_s2 + $0xb0] sm:$0xff]  }
   0x7   :  { %1712 = vmatpush3.bf16.msra.mxu0 %v1922_v2  ;;  %1732 = vmatpush3.bf16.msra.mxu1 %v1932_v6  ;;  %v1944_v19 = vld [vmem:[%s2381_s2 + $0x40] sm:$0xff]   ;;  %v1935_v20 = vld [vmem:[%s2381_s2 + $0xa8] sm:$0xff]   ;;  %v1939_v22 = vld [vmem:[%s2381_s2 + $0x98] sm:$0xff]  }
   0x8   :  { %1713 = vmatprep.subr.bf16.mxu0 %v2004_v0  ;;  %1733 = vmatprep.subr.bf16.mxu1 %v2004_v0  ;;  %v1937_v21 = vld [vmem:[%s2381_s2 + $0xa0] sm:$0xff]   ;;  %v1941_v23 = vld [vmem:[%s2381_s2 + $0x90] sm:$0xff]   ;;  %v1943_v24 = vld [vmem:[%s2381_s2 + $0x88] sm:$0xff]  }
   0x9   :  { %v1945_v25 = vld [vmem:[%s2381_s2 + $0x80] sm:$0xff]   ;;  %v1951_v26 = vld [vmem:[%s2381_s2 + $0x138] sm:$0xff]   ;;  %v1953_v27 = vld [vmem:[%s2381_s2 + $0x130] sm:$0xff]  }
   0xa   :  { %v1955_v28 = vld [vmem:[%s2381_s2 + $0x128] sm:$0xff]   ;;  %v1957_v29 = vld [vmem:[%s2381_s2 + $0x120] sm:$0xff]   ;;  %v1959_v30 = vld [vmem:[%s2381_s2 + $0x118] sm:$0xff]  }
   0xb   :  { %1714 = vmatpush3.bf16.msra.mxu0 %v1923_v3  ;;  %1734 = vmatpush3.bf16.msra.mxu1 %v1934_v8  ;;  %v2167_v49 = vld [vmem:[%s2383_s0] sm:$0xff]   ;;  %v1950_v50 = vld [vmem:[%s2381_s2 + $0xf8] sm:$0xff]   ;;  %v1952_v51 = vld [vmem:[%s2381_s2 + $0xf0] sm:$0xff]  }
   0xc   :  { %1715 = vmatprep.subr.bf16.mxu0 %v2004_v0  ;;  %1735 = vmatprep.subr.bf16.mxu1 %v2004_v0  ;;  %v1954_v52 = vld [vmem:[%s2381_s2 + $0xe8] sm:$0xff]   ;;  %v1956_v53 = vld [vmem:[%s2381_s2 + $0xe0] sm:$0xff]   ;;  %v1958_v54 = vld [vmem:[%s2381_s2 + $0xd8] sm:$0xff]  }
   0xd   :  { %v1960_v55 = vld [vmem:[%s2381_s2 + $0xd0] sm:$0xff]   ;;  %v1962_v57 = vld [vmem:[%s2381_s2 + $0xc8] sm:$0xff]   ;;  %v1964_v59 = vld [vmem:[%s2381_s2 + $0xc0] sm:$0xff]  }
   0xe   :  { %v1961_v56 = vld [vmem:[%s2381_s2 + $0x110] sm:$0xff]   ;;  %v1963_v58 = vld [vmem:[%s2381_s2 + $0x108] sm:$0xff]   ;;  %v1965_v60 = vld [vmem:[%s2381_s2 + $0x100] sm:$0xff]  }
   0xf   :  { %1716 = vmatpush3.bf16.msra.mxu0 %v1924_v5  ;;  %1736 = vmatpush3.bf16.msra.mxu1 %v1936_v10  ;;  %v1373_v61 = vld [vmem:[%s2384_s3] ss:$0 sm:$0xff]  ;;  %v1968_v10 = vld [vmem:[%s2381_s2 + $0x168] sm:$0xff]  }
  0x10   :  { %1717 = vmatprep.subr.bf16.mxu0 %v2004_v0  ;;  %1737 = vmatprep.subr.bf16.mxu1 %v2004_v0 }
  0x13   :  { %1718 = vmatpush3.bf16.msra.mxu0 %v1925_v7  ;;  %1738 = vmatpush3.bf16.msra.mxu1 %v1938_v12  ;;  %v1966_v7 = vld [vmem:[%s2381_s2 + $0x178] sm:$0xff]  }
  0x14   :  { %1719 = vmatprep.subr.bf16.mxu0 %v2004_v0  ;;  %1739 = vmatprep.subr.bf16.mxu1 %v2004_v0  ;;  %v1970_v12 = vld [vmem:[%s2381_s2 + $0x158] sm:$0xff]  }
  0x17   :  { %1720 = vmatpush3.bf16.msra.mxu0 %v1926_v9  ;;  %1740 = vmatpush3.bf16.msra.mxu1 %v1940_v14  ;;  %v1967_v9 = vld [vmem:[%s2381_s2 + $0x170] sm:$0xff]   ;;  %v1972_v14 = vld [vmem:[%s2381_s2 + $0x148] sm:$0xff]  }
  0x18   :  { %1721 = vmatprep.subr.bf16.mxu0 %v2004_v0  ;;  %1741 = vmatprep.subr.bf16.mxu1 %v2004_v0 }
  0x1b   :  { %1722 = vmatpush3.bf16.msra.mxu0 %v1927_v11  ;;  %1742 = vmatpush3.bf16.msra.mxu1 %v1942_v17  ;;  %v1969_v11 = vld [vmem:[%s2381_s2 + $0x160] sm:$0xff]   ;;  %v1979_v17 = vld [vmem:[%s2381_s2 + $0x1b0] sm:$0xff]  }
  0x1c   :  { %1723 = vmatprep.subr.bf16.mxu0 %v2004_v0  ;;  %1743 = vmatprep.subr.bf16.mxu1 %v2004_v0 }
  0x1f   :  { %1724 = vmatpush3.bf16.msra.mxu0 %v1928_v13  ;;  %1744 = vmatpush3.bf16.msra.mxu1 %v1944_v19  ;;  %v1971_v13 = vld [vmem:[%s2381_s2 + $0x150] sm:$0xff]   ;;  %v1983_v19 = vld [vmem:[%s2381_s2 + $0x1a0] sm:$0xff]  }
  0x20   :  { %1749 = vmatprep.subr.bf16.mxu0 %v2004_v0  ;;  %1769 = vmatprep.subr.bf16.mxu1 %v2004_v0 }
  0x22   :  { %1726 = vmatmul.mubr.bf16.vlgmr.msra.gmra.mxu0 %v1930_v15  ;;  %1746 = vmatmul.mubr.bf16.vlgmr.msra.gmra.mxu1 %v1930_v15 }
  0x23   :  { %1750 = vmatpush3.bf16.msra.mxu0 %v1931_v16  ;;  %1765 = vmatprep.mubr.msk.bf16.mxu0 %vm2005_vm0, %v2004_v0  ;;  %v1977_v16 = vld [vmem:[%s2381_s2 + $0x1b8] sm:$0xff]  }
  0x24   :  { %1751 = vmatprep.subr.bf16.mxu0 %v2004_v0  ;;  %1775 = vmatprep.mubr.msk.bf16.mxu1 %vm2005_vm0, %v2004_v0 }
  0x27   :  { %1752 = vmatpush3.bf16.msra.mxu0 %v1933_v18  ;;  %v1981_v18 = vld [vmem:[%s2381_s2 + $0x1a8] sm:$0xff]  }
  0x28   :  { %1753 = vmatprep.subr.bf16.mxu0 %v2004_v0 }
  0x2b   :  { %1754 = vmatpush3.bf16.msra.mxu0 %v1935_v20  ;;  %v1985_v20 = vld [vmem:[%s2381_s2 + $0x198] sm:$0xff]  }
  0x2c   :  { %1755 = vmatprep.subr.bf16.mxu0 %v2004_v0 }
  0x2f   :  { %1756 = vmatpush3.bf16.msra.mxu0 %v1937_v21  ;;  %v1987_v21 = vld [vmem:[%s2381_s2 + $0x190] sm:$0xff]  }
  0x30   :  { %1757 = vmatprep.subr.bf16.mxu0 %v2004_v0 }
  0x33   :  { %1758 = vmatpush3.bf16.msra.mxu0 %v1939_v22 }
  0x34   :  { %1759 = vmatprep.subr.bf16.mxu0 %v2004_v0 }
  0x37   :  { %1760 = vmatpush3.bf16.msra.mxu0 %v1941_v23 }
  0x38   :  { %1761 = vmatprep.subr.bf16.mxu0 %v2004_v0 }
  0x3b   :  { %1762 = vmatpush3.bf16.msra.mxu0 %v1943_v24 }
  0x3c   :  { %1763 = vmatprep.subr.bf16.mxu0 %v2004_v0 }
  0x3f   :  { %1764 = vmatpush3.bf16.msra.mxu0 %v1945_v25 }
  0x40   :  { %1799 = vmatprep.subr.bf16.mxu0 %v2004_v0 }
  0x42   :  { %1766 = vmatmul.mubr.bf16.vlgmr.msra.gmra.mxu0 %v1930_v15  ;;  %v1973_v15 = vld [vmem:[%s2381_s2 + $0x140] sm:$0xff]  }
  0x43   :  { %1815 = vmatprep.mubr.msk.bf16.mxu0 %vm2005_vm0, %v2004_v0  ;;  %1800 = vmatpush3.bf16.msra.mxu0 %v1951_v26 }
  0x44   :  { %1801 = vmatprep.subr.bf16.mxu0 %v2004_v0 }
  0x47   :  { %1802 = vmatpush3.bf16.msra.mxu0 %v1953_v27 }
  0x48   :  { %1803 = vmatprep.subr.bf16.mxu0 %v2004_v0 }
  0x4b   :  { %1804 = vmatpush3.bf16.msra.mxu0 %v1955_v28 }
  0x4c   :  { %1805 = vmatprep.subr.bf16.mxu0 %v2004_v0 }
  0x4f   :  { %1806 = vmatpush3.bf16.msra.mxu0 %v1957_v29 }
  0x50   :  { %1807 = vmatprep.subr.bf16.mxu0 %v2004_v0 }
  0x53   :  { %1808 = vmatpush3.bf16.msra.mxu0 %v1959_v30 }
  0x54   :  { %1809 = vmatprep.subr.bf16.mxu0 %v2004_v0 }
  0x57   :  { %1810 = vmatpush3.bf16.msra.mxu0 %v1961_v56 }
  0x58   :  { %1811 = vmatprep.subr.bf16.mxu0 %v2004_v0 }
  0x5b   :  { %1812 = vmatpush3.bf16.msra.mxu0 %v1963_v58 }
  0x5c   :  { %1813 = vmatprep.subr.bf16.mxu0 %v2004_v0 }
  0x5f   :  { %1814 = vmatpush3.bf16.msra.mxu0 %v1965_v60  ;;  %v1993_v60 = vld [vmem:[%s2381_s2 + $0x238] sm:$0xff]  }
  0x60   :  { %1849 = vmatprep.subr.bf16.mxu0 %v2004_v0 }
  0xe2   :  { %v126_v31 = vpop.f32.mrf.mxu0  ;;  %v242_v36 = vpop.f32.mrf.mxu1 }
  0xe4   :  { %v1727_v32 = vpop.f32.mrf.mxu0  ;;  %v1747_v37 = vpop.f32.mrf.mxu1 }
  0xe6   :  { %v129_v33 = vpop.f32.mrf.mxu0  ;;  %v245_v38 = vpop.f32.mrf.mxu1 }
  0xe7   :  { %v1568_v34 = vpack.c.bf16 %v129_v33, %v126_v31  ;;  %v1573_v39 = vpack.c.bf16 %v245_v38, %v242_v36 }
  0xe8   :  { %v1728_v35 = vpop.f32.mrf.mxu0  ;;  %v1748_v40 = vpop.f32.mrf.mxu1 }
  0xe9   :  { %1569 = vst [vmem:[#allocation2] sm:$0xff] %v1568_v34   ;;  %1610 = vst [vmem:[#allocation2 + $0x8] sm:$0xff] %v1573_v39   ;;  %v1978_v40 = vld [vmem:[%s2381_s2 + $0x1f8] sm:$0xff]  }
  0xf0   :  { %v1947_v47 = vld [vmem:[#allocation2 + $0x8] sm:$0xff]   ;;  %v1948_v48 = vld [vmem:[#allocation2] sm:$0xff]  }
 0x102   :  { %v358_v41 = vpop.f32.mrf.mxu0 }
 0x104   :  { %v1767_v42 = vpop.f32.mrf.mxu0 }
 0x105   :  { %v1982_v42 = vld [vmem:[%s2381_s2 + $0x1e8] sm:$0xff]  }
 0x106   :  { %v361_v43 = vpop.f32.mrf.mxu0 }
 0x107   :  { %v1578_v44 = vpack.c.bf16 %v361_v43, %v358_v41  ;;  %v1980_v41 = vld [vmem:[%s2381_s2 + $0x1f0] sm:$0xff]   ;;  %v1984_v43 = vld [vmem:[%s2381_s2 + $0x1e0] sm:$0xff]  }
 0x108   :  { %v1768_v45 = vpop.f32.mrf.mxu0 }
 0x109   :  { %1611 = vst [vmem:[#allocation2 + $0x10] sm:$0xff] %v1578_v44   ;;  %v1986_v44 = vld [vmem:[%s2381_s2 + $0x1d8] sm:$0xff]   ;;  %v1988_v45 = vld [vmem:[%s2381_s2 + $0x1d0] sm:$0xff]  }
 0x110   :  { %v1946_v46 = vld [vmem:[#allocation2 + $0x10] sm:$0xff]  }
 0x111   :  { %1770 = vmatpush3.bf16.msra.mxu1 %v1946_v46  ;;  %v1989_v46 = vld [vmem:[%s2381_s2 + $0x188] sm:$0xff]  }
 0x112   :  { %1771 = vmatprep.subr.bf16.mxu1 %v2004_v0 }
 0x115   :  { %1772 = vmatpush3.bf16.msra.mxu1 %v1947_v47  ;;  %v1990_v47 = vld [vmem:[%s2381_s2 + $0x1c8] sm:$0xff]  }
 0x116   :  { %1773 = vmatprep.subr.bf16.mxu1 %v2004_v0 }
 0x119   :  { %1774 = vmatpush3.bf16.msra.mxu1 %v1948_v48  ;;  %v1991_v48 = vld [vmem:[%s2381_s2 + $0x180] sm:$0xff]  }
 0x11a   :  { %1779 = vmatprep.subr.bf16.mxu1 %v2004_v0 }
 0x11c   :  { %1776 = vmatmul.mubr.msk.bf16.vlgmr.msra.gmra.mxu1 %vm411_vm1, %v2167_v49 }
 0x11d   :  { %1780 = vmatpush3.bf16.msra.mxu1 %v1950_v50  ;;  %1795 = vmatprep.mubr.msk.bf16.mxu1 %vm2005_vm0, %v2004_v0  ;;  %v1992_v50 = vld [vmem:[%s2381_s2 + $0x1c0] sm:$0xff]  }
 0x11e   :  { %1781 = vmatprep.subr.bf16.mxu1 %v2004_v0 }
 0x121   :  { %1782 = vmatpush3.bf16.msra.mxu1 %v1952_v51  ;;  %v1458_v51 = vld [vmem:[%s2384_s3 + $0x1] ss:$0 sm:$0xff] }
 0x122   :  { %1783 = vmatprep.subr.bf16.mxu1 %v2004_v0 }
 0x125   :  { %1784 = vmatpush3.bf16.msra.mxu1 %v1954_v52 }
 0x126   :  { %1785 = vmatprep.subr.bf16.mxu1 %v2004_v0 }
 0x129   :  { %1786 = vmatpush3.bf16.msra.mxu1 %v1956_v53 }
 0x12a   :  { %1787 = vmatprep.subr.bf16.mxu1 %v2004_v0 }
 0x12d   :  { %1788 = vmatpush3.bf16.msra.mxu1 %v1958_v54 }
 0x12e   :  { %1789 = vmatprep.subr.bf16.mxu1 %v2004_v0 }
 0x131   :  { %1790 = vmatpush3.bf16.msra.mxu1 %v1960_v55 }
 0x132   :  { %1791 = vmatprep.subr.bf16.mxu1 %v2004_v0 }
 0x135   :  { %1792 = vmatpush3.bf16.msra.mxu1 %v1962_v57 }
 0x136   :  { %1793 = vmatprep.subr.bf16.mxu1 %v2004_v0 }
 0x139   :  { %1794 = vmatpush3.bf16.msra.mxu1 %v1964_v59 }
 0x13a   :  { %1819 = vmatprep.subr.bf16.mxu1 %v2004_v0 }
 0x1dc   :  { %v449_v62 = vpop.f32.mrf.mxu1 }
 0x1dd   :  { %v450_v1 = vadd.f32 %v1373_v61, %v449_v62  ;;  %v1994_v62 = vld [vmem:[%s2381_s2 + $0x230] sm:$0xff]  }
 0x1de   :  { %v1777_v63 = vpop.f32.mrf.mxu1 }
 0x1df   :  { %v456_v5 = vmax.f32 %v450_v1, 0.0  ;;  %v1995_v63 = vld [vmem:[%s2381_s2 + $0x228] sm:$0xff]   ;;  %v1996_v1 = vld [vmem:[%s2381_s2 + $0x220] sm:$0xff]  }
 0x1e0   :  { %v452_v2 = vpop.f32.mrf.mxu1 }
 0x1e1   :  { %v453_v3 = vadd.f32 %v1373_v61, %v452_v2  ;;  %v1997_v2 = vld [vmem:[%s2381_s2 + $0x218] sm:$0xff]  }
 0x1e2   :  { %v1778_v4 = vpop.f32.mrf.mxu1 }
 0x1e3   :  { %v457_v6 = vmax.f32 %v453_v3, 0.0  ;;  %v1998_v3 = vld [vmem:[%s2381_s2 + $0x210] sm:$0xff]   ;;  %v1999_v4 = vld [vmem:[%s2381_s2 + $0x208] sm:$0xff]  }
 0x1e5   :  { %v458_v8 = vpack.c.bf16 %v457_v6, %v456_v5  ;;  %v2000_v5 = vld [vmem:[%s2381_s2 + $0x200] sm:$0xff]  }
 0x1e7   :  { %1796 = vmatmul.mubr.bf16.vlgmr.msra.gmra.mxu1 %v458_v8  ;;  %1816 = vmatmul.mubr.bf16.vlgmr.msra.gmra.mxu0 %v458_v8 }
 0x1e8   :  { %1820 = vmatpush3.bf16.msra.mxu1 %v1966_v7  ;;  %1835 = vmatprep.mubr.msk.bf16.mxu1 %vm2005_vm0, %v2004_v0 }
 0x1e9   :  { %1821 = vmatprep.subr.bf16.mxu1 %v2004_v0  ;;  %1865 = vmatprep.mubr.msk.bf16.mxu0 %vm2005_vm0, %v2004_v0 }
 0x1ea   :  { %1850 = vmatpush3.bf16.msra.mxu0 %v1977_v16 }
 0x1eb   :  { %1851 = vmatprep.subr.bf16.mxu0 %v2004_v0 }
 0x1ec   :  { %1822 = vmatpush3.bf16.msra.mxu1 %v1967_v9 }
 0x1ed   :  { %1823 = vmatprep.subr.bf16.mxu1 %v2004_v0 }
 0x1ee   :  { %1852 = vmatpush3.bf16.msra.mxu0 %v1979_v17 }
 0x1ef   :  { %1853 = vmatprep.subr.bf16.mxu0 %v2004_v0 }
 0x1f0   :  { %1824 = vmatpush3.bf16.msra.mxu1 %v1968_v10 }
 0x1f1   :  { %1825 = vmatprep.subr.bf16.mxu1 %v2004_v0 }
 0x1f2   :  { %1854 = vmatpush3.bf16.msra.mxu0 %v1981_v18 }
 0x1f3   :  { %1855 = vmatprep.subr.bf16.mxu0 %v2004_v0 }
 0x1f4   :  { %1826 = vmatpush3.bf16.msra.mxu1 %v1969_v11 }
 0x1f5   :  { %1827 = vmatprep.subr.bf16.mxu1 %v2004_v0 }
 0x1f6   :  { %1856 = vmatpush3.bf16.msra.mxu0 %v1983_v19 }
 0x1f7   :  { %1857 = vmatprep.subr.bf16.mxu0 %v2004_v0 }
 0x1f8   :  { %1828 = vmatpush3.bf16.msra.mxu1 %v1970_v12 }
 0x1f9   :  { %1829 = vmatprep.subr.bf16.mxu1 %v2004_v0 }
 0x1fa   :  { %1858 = vmatpush3.bf16.msra.mxu0 %v1985_v20 }
 0x1fb   :  { %1859 = vmatprep.subr.bf16.mxu0 %v2004_v0 }
 0x1fc   :  { %1830 = vmatpush3.bf16.msra.mxu1 %v1971_v13 }
 0x1fd   :  { %1831 = vmatprep.subr.bf16.mxu1 %v2004_v0 }
 0x1fe   :  { %1860 = vmatpush3.bf16.msra.mxu0 %v1987_v21 }
 0x1ff   :  { %1861 = vmatprep.subr.bf16.mxu0 %v2004_v0 }
 0x200   :  { %1832 = vmatpush3.bf16.msra.mxu1 %v1972_v14 }
 0x201   :  { %1833 = vmatprep.subr.bf16.mxu1 %v2004_v0 }
 0x202   :  { %1862 = vmatpush3.bf16.msra.mxu0 %v1989_v46 }
 0x203   :  { %1863 = vmatprep.subr.bf16.mxu0 %v2004_v0 }
 0x204   :  { %1834 = vmatpush3.bf16.msra.mxu1 %v1973_v15 }
 0x205   :  { %1839 = vmatprep.subr.bf16.mxu1 %v2004_v0 }
 0x206   :  { %1864 = vmatpush3.bf16.msra.mxu0 %v1991_v48 }
 0x207   :  { %1836 = vmatmul.mubr.bf16.vlgmr.msra.gmra.mxu1 %v458_v8  ;;  %1889 = vmatprep.subr.bf16.mxu0 %v2004_v0 }
 0x208   :  { %1845 = vmatprep.mubr.msk.bf16.mxu1 %vm2005_vm0, %v2004_v0 }
 0x2a7   :  { %v558_v22 = vpop.f32.mrf.mxu1  ;;  %v674_v23 = vpop.f32.mrf.mxu0 }
 0x2a9   :  { %v1797_v24 = vpop.f32.mrf.mxu1  ;;  %v1817_v25 = vpop.f32.mrf.mxu0 }
 0x2aa   :  { %v1542_v24 = vld [vmem:[%s2384_s3 + $0x2] ss:$0 sm:$0xff] }
 0x2ab   :  { %v561_v26 = vpop.f32.mrf.mxu1  ;;  %v677_v27 = vpop.f32.mrf.mxu0 }
 0x2ac   :  { %v1583_v28 = vpack.c.bf16 %v561_v26, %v558_v22  ;;  %v1588_v29 = vpack.c.bf16 %v677_v27, %v674_v23 }
 0x2ad   :  { %v1798_v30 = vpop.f32.mrf.mxu1  ;;  %v1818_v31 = vpop.f32.mrf.mxu0 }
 0x2ae   :  { %1584 = vst [vmem:[#allocation2] sm:$0xff] %v1583_v28   ;;  %1612 = vst [vmem:[#allocation2 + $0x8] sm:$0xff] %v1588_v29  }
 0x2b5   :  { %v1975_v38 = vld [vmem:[#allocation2 + $0x8] sm:$0xff]   ;;  %v1976_v39 = vld [vmem:[#allocation2] sm:$0xff]  }
 0x2c7   :  { %v790_v32 = vpop.f32.mrf.mxu1 }
 0x2c9   :  { %v1837_v33 = vpop.f32.mrf.mxu1 }
 0x2cb   :  { %v793_v34 = vpop.f32.mrf.mxu1 }
 0x2cc   :  { %v1593_v35 = vpack.c.bf16 %v793_v34, %v790_v32 }
 0x2cd   :  { %v1838_v36 = vpop.f32.mrf.mxu1 }
 0x2ce   :  { %1613 = vst [vmem:[#allocation2 + $0x10] sm:$0xff] %v1593_v35  }
 0x2d5   :  { %v1974_v37 = vld [vmem:[#allocation2 + $0x10] sm:$0xff]  }
 0x2d6   :  { %1840 = vmatpush3.bf16.msra.mxu1 %v1974_v37 }
 0x2d7   :  { %1841 = vmatprep.subr.bf16.mxu1 %v2004_v0 }
 0x2da   :  { %1842 = vmatpush3.bf16.msra.mxu1 %v1975_v38 }
 0x2db   :  { %1843 = vmatprep.subr.bf16.mxu1 %v2004_v0 }
 0x2de   :  { %1844 = vmatpush3.bf16.msra.mxu1 %v1976_v39 }
 0x2df   :  { %1869 = vmatprep.subr.bf16.mxu1 %v2004_v0 }
 0x2e1   :  { %1846 = vmatmul.mubr.msk.bf16.vlgmr.msra.gmra.mxu1 %vm411_vm1, %v2167_v49 }
 0x2e2   :  { %1870 = vmatpush3.bf16.msra.mxu1 %v1978_v40  ;;  %1885 = vmatprep.mubr.msk.bf16.mxu1 %vm2005_vm0, %v2004_v0 }
 0x2e3   :  { %1871 = vmatprep.subr.bf16.mxu1 %v2004_v0 }
 0x2e6   :  { %1872 = vmatpush3.bf16.msra.mxu1 %v1980_v41 }
 0x2e7   :  { %1873 = vmatprep.subr.bf16.mxu1 %v2004_v0 }
 0x2ea   :  { %1874 = vmatpush3.bf16.msra.mxu1 %v1982_v42 }
 0x2eb   :  { %1875 = vmatprep.subr.bf16.mxu1 %v2004_v0 }
 0x2ee   :  { %1876 = vmatpush3.bf16.msra.mxu1 %v1984_v43 }
 0x2ef   :  { %1877 = vmatprep.subr.bf16.mxu1 %v2004_v0 }
 0x2f2   :  { %1878 = vmatpush3.bf16.msra.mxu1 %v1986_v44 }
 0x2f3   :  { %1879 = vmatprep.subr.bf16.mxu1 %v2004_v0 }
 0x2f6   :  { %1880 = vmatpush3.bf16.msra.mxu1 %v1988_v45 }
 0x2f7   :  { %1881 = vmatprep.subr.bf16.mxu1 %v2004_v0 }
 0x2fa   :  { %1882 = vmatpush3.bf16.msra.mxu1 %v1990_v47 }
 0x2fb   :  { %1883 = vmatprep.subr.bf16.mxu1 %v2004_v0 }
 0x2fe   :  { %1884 = vmatpush3.bf16.msra.mxu1 %v1992_v50 }
 0x2ff   :  { %1909 = vmatprep.subr.bf16.mxu1 %v2004_v0 }
 0x3a1   :  { %v873_v52 = vpop.f32.mrf.mxu1 }
 0x3a2   :  { %v874_v54 = vadd.f32 %v1458_v51, %v873_v52 }
 0x3a3   :  { %v1847_v53 = vpop.f32.mrf.mxu1 }
 0x3a4   :  { %v880_v58 = vmax.f32 %v874_v54, 0.0 }
 0x3a5   :  { %v876_v55 = vpop.f32.mrf.mxu1 }
 0x3a6   :  { %v877_v56 = vadd.f32 %v1458_v51, %v876_v55 }
 0x3a7   :  { %v1848_v57 = vpop.f32.mrf.mxu1 }
 0x3a8   :  { %v881_v59 = vmax.f32 %v877_v56, 0.0 }
 0x3aa   :  { %v882_v61 = vpack.c.bf16 %v881_v59, %v880_v58 }
 0x3ac   :  { %1866 = vmatmul.mubr.bf16.vlgmr.msra.gmra.mxu0 %v882_v61  ;;  %1886 = vmatmul.mubr.bf16.vlgmr.msra.gmra.mxu1 %v882_v61 }
 0x3ad   :  { %1890 = vmatpush3.bf16.msra.mxu0 %v1993_v60  ;;  %1905 = vmatprep.mubr.msk.bf16.mxu0 %vm2005_vm0, %v2004_v0 }
 0x3ae   :  { %1891 = vmatprep.subr.bf16.mxu0 %v2004_v0  ;;  %1915 = vmatprep.mubr.msk.bf16.mxu1 %vm2005_vm0, %v2004_v0 }
 0x3b1   :  { %1892 = vmatpush3.bf16.msra.mxu0 %v1994_v62 }
 0x3b2   :  { %1893 = vmatprep.subr.bf16.mxu0 %v2004_v0 }
 0x3b5   :  { %1894 = vmatpush3.bf16.msra.mxu0 %v1995_v63 }
 0x3b6   :  { %1895 = vmatprep.subr.bf16.mxu0 %v2004_v0 }
 0x3b9   :  { %1896 = vmatpush3.bf16.msra.mxu0 %v1996_v1 }
 0x3ba   :  { %1897 = vmatprep.subr.bf16.mxu0 %v2004_v0 }
 0x3bd   :  { %1898 = vmatpush3.bf16.msra.mxu0 %v1997_v2 }
 0x3be   :  { %1899 = vmatprep.subr.bf16.mxu0 %v2004_v0 }
 0x3c1   :  { %1900 = vmatpush3.bf16.msra.mxu0 %v1998_v3 }
 0x3c2   :  { %1901 = vmatprep.subr.bf16.mxu0 %v2004_v0 }
 0x3c5   :  { %1902 = vmatpush3.bf16.msra.mxu0 %v1999_v4 }
 0x3c6   :  { %1903 = vmatprep.subr.bf16.mxu0 %v2004_v0 }
 0x3c9   :  { %1904 = vmatpush3.bf16.msra.mxu0 %v2000_v5 }
 0x3cc   :  { %1906 = vmatmul.mubr.bf16.vlgmr.msra.gmra.mxu0 %v882_v61 }
 0x46c   :  { %v982_v6 = vpop.f32.mrf.mxu0  ;;  %v1098_v7 = vpop.f32.mrf.mxu1 }
 0x46e   :  { %v1867_v8 = vpop.f32.mrf.mxu0  ;;  %v1887_v9 = vpop.f32.mrf.mxu1 }
 0x470   :  { %v985_v10 = vpop.f32.mrf.mxu0  ;;  %v1101_v11 = vpop.f32.mrf.mxu1 }
 0x471   :  { %v1598_v12 = vpack.c.bf16 %v985_v10, %v982_v6  ;;  %v1603_v13 = vpack.c.bf16 %v1101_v11, %v1098_v7 }
 0x472   :  { %v1868_v14 = vpop.f32.mrf.mxu0  ;;  %v1888_v15 = vpop.f32.mrf.mxu1 }
 0x473   :  { %1599 = vst [vmem:[#allocation2] sm:$0xff] %v1598_v12   ;;  %1614 = vst [vmem:[#allocation2 + $0x8] sm:$0xff] %v1603_v13  }
 0x47a   :  { %v2002_v22 = vld [vmem:[#allocation2 + $0x8] sm:$0xff]   ;;  %v2003_v23 = vld [vmem:[#allocation2] sm:$0xff]  }
 0x48c   :  { %v1214_v16 = vpop.f32.mrf.mxu0 }
 0x48e   :  { %v1907_v17 = vpop.f32.mrf.mxu0 }
 0x490   :  { %v1217_v18 = vpop.f32.mrf.mxu0 }
 0x491   :  { %v1608_v19 = vpack.c.bf16 %v1217_v18, %v1214_v16 }
 0x492   :  { %v1908_v20 = vpop.f32.mrf.mxu0 }
 0x493   :  { %1615 = vst [vmem:[#allocation2 + $0x10] sm:$0xff] %v1608_v19  }
 0x49a   :  { %v2001_v21 = vld [vmem:[#allocation2 + $0x10] sm:$0xff]  }
 0x49b   :  { %1910 = vmatpush3.bf16.msra.mxu1 %v2001_v21 }
 0x49c   :  { %1911 = vmatprep.subr.bf16.mxu1 %v2004_v0 }
 0x49f   :  { %1912 = vmatpush3.bf16.msra.mxu1 %v2002_v22 }
 0x4a0   :  { %1913 = vmatprep.subr.bf16.mxu1 %v2004_v0 }
 0x4a3   :  { %1914 = vmatpush3.bf16.msra.mxu1 %v2003_v23 }
 0x4a6   :  { %1916 = vmatmul.mubr.msk.bf16.vlgmr.msra.gmra.mxu1 %vm411_vm1, %v2167_v49 }
 0x566   :  { %v1297_v25 = vpop.f32.mrf.mxu1 }
 0x567   :  { %v1298_v26 = vadd.f32 %v1542_v24, %v1297_v25 }
 0x568   :  { %v1917_v27 = vpop.f32.mrf.mxu1 }
 0x569   :  { %1304 = vst [vmem:[%s2385_s4] sm:$0xff] %v1298_v26 }
 0x56a   :  { %v1300_v28 = vpop.f32.mrf.mxu1 }
 0x56b   :  { %v1301_v29 = vadd.f32 %v1542_v24, %v1300_v28 }
 0x56c   :  { %v1918_v30 = vpop.f32.mrf.mxu1 }
 0x56d   :  { %1305 = vst [vmem:[%s2385_s4 + $0x8] sm:$0xff] %v1301_v29 }

</bundles_post_ra>
